<compile_context>
chip_gen: v7x
topology: tpu7x:2x2x1
jax: 0.10.0
libtpu: 0.0.40
codegen_flags: <defaults>
</compile_context>

<pallas_src>
import numpy as np
import jax
import jax.numpy as jnp
from jax import lax
from jax.experimental import pallas as pl
from jax.experimental.pallas import tpu as pltpu


# ----------------------------------------------------------------------------
# Host-side construction of the fused blur+pool matrices
# ----------------------------------------------------------------------------
def _gaussian_1d(kernel_size: int, sigma: float = 1.0) -> np.ndarray:
    """Normalized 1D gaussian; the module's 2D kernel is its outer product."""
    kernel_range = np.arange(-kernel_size // 2 + 1.0, kernel_size // 2 + 1.0)
    g = np.exp(-(kernel_range ** 2) / (2.0 * sigma ** 2))
    return g / g.sum()


def _gaussian_kernel_2d(kernel_size: int, sigma: float = 1.0) -> np.ndarray:
    """Exact replica of GaussianPyramid.gaussian_kernel (numpy part)."""
    kernel_range = np.arange(-kernel_size // 2 + 1.0, kernel_size // 2 + 1.0)
    x, y = np.meshgrid(kernel_range, kernel_range)
    kernel = np.exp(-(x ** 2 + y ** 2) / (2 * sigma ** 2))
    kernel /= np.sum(kernel)
    return kernel.astype(np.float32)


def _blurpool_matrices(H, W, K, sigma):
    """L (Ho,H), R (W,Wo) with L @ plane @ R == area_pool(conv2d(plane, gauss, pad=K//2))."""
    pad = K // 2
    g = _gaussian_1d(K, sigma)                      # float64

    def blur_mat(n):
        B = np.zeros((n, n), np.float64)
        for i in range(n):
            for d in range(K):
                j = i + d - pad                     # zero padding folded in
                if 0 <= j < n:
                    B[i, j] += g[d]
        return B

    def pool_mat(n):
        A = np.zeros((n // 2, n), np.float64)
        for i in range(n // 2):
            A[i, 2 * i] = 0.5
            A[i, 2 * i + 1] = 0.5
        return A

    L = pool_mat(H) @ blur_mat(H)                   # (Ho, H)
    R = (pool_mat(W) @ blur_mat(W)).T               # (W, Wo)
    return np.asarray(L, np.float32), np.asarray(R, np.float32)


# ----------------------------------------------------------------------------
# Fused multi-level Pallas kernel
# ----------------------------------------------------------------------------
def _make_pyramid_call(npad, H, W, levels, tn, compute_dtype, vmem_limit):
    """pallas_call computing all pyramid levels 1..levels-1 from (npad, H, W) planes."""
    n_lvl = levels - 1

    # static per-level shapes: (Hp, Wp) -> (Ho, Wo)
    shapes = []
    h, w = H, W
    for _ in range(n_lvl):
        shapes.append((h, w, h // 2, w // 2))
        h, w = h // 2, w // 2

    def kernel(*refs):
        x_ref = refs[0]
        lr_refs = refs[1:1 + 2 * n_lvl]
        out_refs = refs[1 + 2 * n_lvl:1 + 3 * n_lvl]
        t_refs = refs[1 + 3 * n_lvl:]

        for l, (hp, wp, ho, wo) in enumerate(shapes):
            in_ref = x_ref if l == 0 else out_refs[l - 1]          # level input (VMEM)
            l_mat = lr_refs[2 * l][...].astype(compute_dtype)      # (ho, hp)
            r_mat = lr_refs[2 * l + 1][...].astype(compute_dtype)  # (wp, wo)
            t_ref = t_refs[l]                                      # (tn, ho, wp) f32 scratch

            # ---- H blur+pool: per-plane 2D MXU matmuls, no batch dims, no broadcast ----
            def h_body(n, carry):
                plane = in_ref[n].astype(compute_dtype)            # (hp, wp)
                t_ref[n] = jnp.dot(l_mat, plane,
                                   preferred_element_type=jnp.float32)
                return carry
            lax.fori_loop(0, tn, h_body, 0)

            # ---- W blur+pool ----
            if ho % 8 == 0:
                # One flat 2D matmul: M = tn*ho rows feed the MXU; the reshapes
                # are layout-preserving (leading dim merged into an 8-aligned
                # sublane dim), so no relayout copies.
                y = t_ref[...].astype(compute_dtype).reshape(tn * ho, wp)
                z = jnp.dot(y, r_mat, preferred_element_type=jnp.float32)
                out_refs[l][...] = z.reshape(tn, ho, wo).astype(out_refs[l].dtype)
            else:
                # Deep levels where ho < 8: avoid non-aligned reshapes, fall back
                # to per-plane 2D matmuls (tiny data, negligible cost).
                o_ref = out_refs[l]

                def w_body(n, carry):
                    o_ref[n] = jnp.dot(t_ref[n].astype(compute_dtype), r_mat,
                                       preferred_element_type=jnp.float32
                                       ).astype(o_ref.dtype)
                    return carry
                lax.fori_loop(0, tn, w_body, 0)

    in_specs = [pl.BlockSpec((tn, H, W), lambda g: (g, 0, 0))]
    out_specs = []
    out_shapes = []
    scratch = []
    for (hp, wp, ho, wo) in shapes:
        in_specs.append(pl.BlockSpec((ho, hp), lambda g: (0, 0)))   # L_l (full block)
        in_specs.append(pl.BlockSpec((wp, wo), lambda g: (0, 0)))   # R_l (full block)
        out_specs.append(pl.BlockSpec((tn, ho, wo), lambda g: (g, 0, 0)))
        out_shapes.append(jax.ShapeDtypeStruct((npad, ho, wo), jnp.float32))
        scratch.append(pltpu.VMEM((tn, ho, wp), jnp.float32))       # H-pass result

    # TODO(synk): lane-dense (packed) output layout for levels with Wo < 128; the
    # required in-kernel reshape would itself introduce a relayout copy here.
    return pl.pallas_call(
        kernel,
        out_shape=tuple(out_shapes),
        grid=(npad // tn,),
        in_specs=in_specs,
        out_specs=tuple(out_specs),
        scratch_shapes=scratch,
        compiler_params=pltpu.CompilerParams(
            dimension_semantics=("parallel",),
            vmem_limit_bytes=int(vmem_limit)),
    )


# ----------------------------------------------------------------------------
# Generation-aware sizing
# ----------------------------------------------------------------------------
def _tpu_vmem_and_cores():
    """(VMEM capacity bytes, TensorCores per chip) with conservative fallbacks."""
    vmem_cap = 64 * 1024 * 1024            # conservative default (v7x-sized)
    cores = 1
    try:
        info = pltpu.get_tpu_info()
        cap = getattr(info, "vmem_capacity_bytes", None)
        if cap:
            vmem_cap = int(cap)
    except Exception:
        pass
    try:
        kind = jax.devices()[0].device_kind.lower()
        if "7" in kind:                    # v7x: 2 TensorCores per chip
            cores = 2
    except Exception:
        pass
    return vmem_cap, cores


# ----------------------------------------------------------------------------
# Wrapper (JAX equivalent of GaussianPyramid.forward)
# ----------------------------------------------------------------------------
def gaussian_pyramid(x, levels, kernel_size=5, sigma=1.0, compute_dtype=jnp.float32):
    """x: (B, C, V, H, W).  Returns list of `levels` arrays, level l has shape
    (B, C, V, H // 2**l, W // 2**l).  compute_dtype=jnp.bfloat16 is a valid
    option for v6e/v7x (f32 accumulation kept); default f32 matches torch."""
    b, c, v, h, w = x.shape
    if levels <= 1:
        return [x]
    down = 2 ** (levels - 1)
    assert h % down == 0 and w % down == 0, (
        "H and W must be divisible by 2**(levels-1) for area pooling to be a 2x2 mean")
    # TODO(synk): odd intermediate sizes (torch's conv/interpolate floor them) are unsupported.

    N = b * c * v
    cur = x.reshape(N, h, w).astype(compute_dtype)

    # --- tile sizing: derived from actual VMEM capacity (review items 5/6/7/8) ---
    vmem_cap, cores = _tpu_vmem_and_cores()
    # rough per-plane VMEM bill (f32 equivalent): 2x double-buffered input block,
    # 2x double-buffered outputs (~HW/3), per-level scratches (~2HW/3), live
    # matmul operands/results (~3HW/4)  ->  ~4.5 * HW * 4 bytes.
    plane_bytes = 18 * h * w
    budget = max(plane_bytes, vmem_cap // 2)
    tn = max(1, budget // plane_bytes)
    tn = min(tn, N)
    if cores > 1 and N > 1:
        # only split for parallelism when the chip really has >1 TensorCore
        tn = min(tn, pl.cdiv(N, cores))
    steps = pl.cdiv(N, tn)
    if cores > 1 and steps > 1 and steps % cores != 0:
        steps = pl.cdiv(steps, cores) * cores        # balanced megacore split
    npad = steps * tn
    if npad != N:
        cur = jnp.pad(cur, ((0, npad - N), (0, 0), (0, 0)))

    working = plane_bytes * tn
    vmem_limit = int(min(0.9 * vmem_cap, max(1.25 * working, 32 * 1024 * 1024)))

    # Per-level fused blur+pool matrices (padding, separable gaussian, area pool folded in).
    mats = []
    hh, ww = h, w
    for _ in range(1, levels):
        L, R = _blurpool_matrices(hh, ww, kernel_size, sigma)
        mats += [jnp.asarray(L), jnp.asarray(R)]
        hh, ww = hh // 2, ww // 2

    outs = _make_pyramid_call(npad, h, w, levels, tn, compute_dtype, vmem_limit)(cur, *mats)
    if not isinstance(outs, (list, tuple)):
        outs = (outs,)

    pyramid = [x]                                    # level 0 = the original images
    hh, ww = h, w
    for l in range(1, levels):
        hh, ww = hh // 2, ww // 2
        pyramid.append(outs[l - 1][:N].reshape(b, c, v, hh, ww))
    return pyramid


# ----------------------------------------------------------------------------
# Pure-jnp reference (direct 5x5 conv + 2x2 mean) for a correctness check
# ----------------------------------------------------------------------------
def _reference_pyramid(x, levels, kernel_size=5, sigma=1.0):
    b, c, v, h, w = x.shape
    K = kernel_size
    pad = K // 2
    w2d = jnp.asarray(_gaussian_kernel_2d(K, sigma))
    out = [x]
    cur = x.reshape(b * c * v, h, w).astype(jnp.float32)
    H, W = h, w
    for _ in range(1, levels):
        xp = jnp.pad(cur, ((0, 0), (pad, pad), (pad, pad)))
        blur = jnp.zeros_like(cur)
        for di in range(K):
            for dj in range(K):
                blur = blur + w2d[di, dj] * xp[:, di:di + H, dj:dj + W]
        cur = blur.reshape(-1, H // 2, 2, W // 2, 2).mean(axis=(2, 4))
        H, W = H // 2, W // 2
        out.append(cur.reshape(b, c, v, H, W))
    return out


if __name__ == "__main__":
    key = jax.random.PRNGKey(0)
    # C=1 is the only case the torch module runs as written (groups=c with a (1,1,k,k) weight).
    B, C, V, H, W = 2, 1, 4, 16, 16
    LEVELS = 3
    x = jax.random.normal(key, (B, C, V, H, W), dtype=jnp.float32)

    pyr = gaussian_pyramid(x, LEVELS, kernel_size=5, sigma=1.0)
    pyr = [jax.block_until_ready(p) for p in pyr]

    ref = _reference_pyramid(x, LEVELS, kernel_size=5, sigma=1.0)
    for lvl, (a, r) in enumerate(zip(pyr, ref)):
        assert a.shape == r.shape, (lvl, a.shape, r.shape)
        np.testing.assert_allclose(np.asarray(a), np.asarray(r), rtol=1e-5, atol=1e-5)

    print("KERNEL_OK")
</pallas_src>

<mosaic_0001>
module attributes {stable_mosaic.version = 11 : i64} {
  func.func @kernel(%arg0: i32, %arg1: memref<8x16x16xf32, #tpu.memory_space<vmem>>, %arg2: memref<8x16xf32, #tpu.memory_space<vmem>>, %arg3: memref<16x8xf32, #tpu.memory_space<vmem>>, %arg4: memref<4x8xf32, #tpu.memory_space<vmem>>, %arg5: memref<8x4xf32, #tpu.memory_space<vmem>>, %arg6: memref<8x8x8xf32, #tpu.memory_space<vmem>>, %arg7: memref<8x4x4xf32, #tpu.memory_space<vmem>>, %arg8: memref<8x8x16xf32, #tpu.memory_space<vmem>>, %arg9: memref<8x4x8xf32, #tpu.memory_space<vmem>>) attributes {dimension_semantics = [#tpu.dimension_semantics<parallel>], iteration_bounds = array<i64: 1>, scalar_prefetch = 0 : i64, scratch_operands = 2 : i64, tpu.core_type = #tpu.core_type<tc>, window_params = [{transform_indices = @transform_0, window_bounds = array<i64: 8, 16, 16>}, {pipeline_mode = #tpu.pipeline_mode<synchronous>, transform_indices = @transform_1, window_bounds = array<i64: 8, 16>}, {pipeline_mode = #tpu.pipeline_mode<synchronous>, transform_indices = @transform_2, window_bounds = array<i64: 16, 8>}, {pipeline_mode = #tpu.pipeline_mode<synchronous>, transform_indices = @transform_3, window_bounds = array<i64: 4, 8>}, {pipeline_mode = #tpu.pipeline_mode<synchronous>, transform_indices = @transform_4, window_bounds = array<i64: 8, 4>}, {transform_indices = @transform_5, window_bounds = array<i64: 8, 8, 8>}, {transform_indices = @transform_6, window_bounds = array<i64: 8, 4, 4>}]} {
    %c0 = arith.constant 0 : index
    %c0_0 = arith.constant 0 : index
    %0 = vector.load %arg2[%c0, %c0_0] : memref<8x16xf32, #tpu.memory_space<vmem>>, vector<8x16xf32>
    %c0_1 = arith.constant 0 : index
    %c0_2 = arith.constant 0 : index
    %1 = vector.load %arg3[%c0_1, %c0_2] : memref<16x8xf32, #tpu.memory_space<vmem>>, vector<16x8xf32>
    %c0_i32 = arith.constant 0 : i32
    %c8_i32 = arith.constant 8 : i32
    %2 = arith.addi %c0_i32, %c8_i32 : i32
    %c1_i32 = arith.constant 1 : i32
    scf.for %arg10 = %c0_i32 to %2 step %c1_i32  : i32 {
      %12 = arith.index_cast %arg10 : i32 to index
      %c0_22 = arith.constant 0 : index
      %c0_23 = arith.constant 0 : index
      %13 = vector.load %arg1[%12, %c0_22, %c0_23] : memref<8x16x16xf32, #tpu.memory_space<vmem>>, vector<1x16x16xf32>
      %14 = vector.shape_cast %13 : vector<1x16x16xf32> to vector<16x16xf32>
      %cst_24 = arith.constant dense<0.000000e+00> : vector<8x16xf32>
      %15 = tpu.matmul %0, %14, %cst_24 {dimension_numbers = #tpu.dot_dimension_numbers<[1], [0], [0], [1], [0, 0, 1, 1], [], []>} : vector<8x16xf32>, vector<16x16xf32>, vector<8x16xf32> -> vector<8x16xf32>
      %16 = arith.index_cast %arg10 : i32 to index
      %c0_25 = arith.constant 0 : index
      %c0_26 = arith.constant 0 : index
      %17 = vector.load %arg8[%16, %c0_25, %c0_26] : memref<8x8x16xf32, #tpu.memory_space<vmem>>, vector<1x8x16xf32>
      %18 = vector.shape_cast %17 : vector<1x8x16xf32> to vector<8x16xf32>
      %19 = vector.shape_cast %15 : vector<8x16xf32> to vector<1x8x16xf32>
      tpu.vector_store %arg8[%16, %c0_25, %c0_26], %19 {strides = array<i32>} : memref<8x8x16xf32, #tpu.memory_space<vmem>>, vector<1x8x16xf32>,
    }
    %c8_i32_3 = arith.constant 8 : i32
    %c0_4 = arith.constant 0 : index
    %c0_5 = arith.constant 0 : index
    %c0_6 = arith.constant 0 : index
    %3 = vector.load %arg8[%c0_4, %c0_5, %c0_6] : memref<8x8x16xf32, #tpu.memory_space<vmem>>, vector<8x8x16xf32>
    %4 = vector.shape_cast %3 : vector<8x8x16xf32> to vector<64x16xf32>
    %cst = arith.constant dense<0.000000e+00> : vector<64x8xf32>
    %5 = tpu.matmul %4, %1, %cst {dimension_numbers = #tpu.dot_dimension_numbers<[1], [0], [0], [1], [0, 0, 1, 1], [], []>} : vector<64x16xf32>, vector<16x8xf32>, vector<64x8xf32> -> vector<64x8xf32>
    %6 = vector.shape_cast %5 : vector<64x8xf32> to vector<8x8x8xf32>
    %c0_7 = arith.constant 0 : index
    %c0_8 = arith.constant 0 : index
    %c0_9 = arith.constant 0 : index
    %7 = vector.load %arg6[%c0_7, %c0_8, %c0_9] : memref<8x8x8xf32, #tpu.memory_space<vmem>>, vector<8x8x8xf32>
    tpu.vector_store %arg6[%c0_7, %c0_8, %c0_9], %6 {strides = array<i32>} : memref<8x8x8xf32, #tpu.memory_space<vmem>>, vector<8x8x8xf32>,
    %c0_10 = arith.constant 0 : index
    %c0_11 = arith.constant 0 : index
    %8 = vector.load %arg4[%c0_10, %c0_11] : memref<4x8xf32, #tpu.memory_space<vmem>>, vector<4x8xf32>
    %c0_12 = arith.constant 0 : index
    %c0_13 = arith.constant 0 : index
    %9 = vector.load %arg5[%c0_12, %c0_13] : memref<8x4xf32, #tpu.memory_space<vmem>>, vector<8x4xf32>
    %c0_i32_14 = arith.constant 0 : i32
    %c8_i32_15 = arith.constant 8 : i32
    %10 = arith.addi %c0_i32_14, %c8_i32_15 : i32
    %c1_i32_16 = arith.constant 1 : i32
    scf.for %arg10 = %c0_i32_14 to %10 step %c1_i32_16  : i32 {
      %12 = arith.index_cast %arg10 : i32 to index
      %c0_22 = arith.constant 0 : index
      %c0_23 = arith.constant 0 : index
      %13 = vector.load %arg6[%12, %c0_22, %c0_23] : memref<8x8x8xf32, #tpu.memory_space<vmem>>, vector<1x8x8xf32>
      %14 = vector.shape_cast %13 : vector<1x8x8xf32> to vector<8x8xf32>
      %cst_24 = arith.constant dense<0.000000e+00> : vector<4x8xf32>
      %15 = tpu.matmul %8, %14, %cst_24 {dimension_numbers = #tpu.dot_dimension_numbers<[1], [0], [0], [1], [0, 0, 1, 1], [], []>} : vector<4x8xf32>, vector<8x8xf32>, vector<4x8xf32> -> vector<4x8xf32>
      %16 = arith.index_cast %arg10 : i32 to index
      %c0_25 = arith.constant 0 : index
      %c0_26 = arith.constant 0 : index
      %17 = vector.load %arg9[%16, %c0_25, %c0_26] : memref<8x4x8xf32, #tpu.memory_space<vmem>>, vector<1x4x8xf32>
      %18 = vector.shape_cast %17 : vector<1x4x8xf32> to vector<4x8xf32>
      %19 = vector.shape_cast %15 : vector<4x8xf32> to vector<1x4x8xf32>
      tpu.vector_store %arg9[%16, %c0_25, %c0_26], %19 {strides = array<i32>} : memref<8x4x8xf32, #tpu.memory_space<vmem>>, vector<1x4x8xf32>,
    }
    %c8_i32_17 = arith.constant 8 : i32
    %c0_i32_18 = arith.constant 0 : i32
    %c8_i32_19 = arith.constant 8 : i32
    %11 = arith.addi %c0_i32_18, %c8_i32_19 : i32
    %c1_i32_20 = arith.constant 1 : i32
    scf.for %arg10 = %c0_i32_18 to %11 step %c1_i32_20  : i32 {
      %12 = arith.index_cast %arg10 : i32 to index
      %c0_22 = arith.constant 0 : index
      %c0_23 = arith.constant 0 : index
      %13 = vector.load %arg9[%12, %c0_22, %c0_23] : memref<8x4x8xf32, #tpu.memory_space<vmem>>, vector<1x4x8xf32>
      %14 = vector.shape_cast %13 : vector<1x4x8xf32> to vector<4x8xf32>
      %cst_24 = arith.constant dense<0.000000e+00> : vector<4x4xf32>
      %15 = tpu.matmul %14, %9, %cst_24 {dimension_numbers = #tpu.dot_dimension_numbers<[1], [0], [0], [1], [0, 0, 1, 1], [], []>} : vector<4x8xf32>, vector<8x4xf32>, vector<4x4xf32> -> vector<4x4xf32>
      %16 = arith.index_cast %arg10 : i32 to index
      %c0_25 = arith.constant 0 : index
      %c0_26 = arith.constant 0 : index
      %17 = vector.load %arg7[%16, %c0_25, %c0_26] : memref<8x4x4xf32, #tpu.memory_space<vmem>>, vector<1x4x4xf32>
      %18 = vector.shape_cast %17 : vector<1x4x4xf32> to vector<4x4xf32>
      %19 = vector.shape_cast %15 : vector<4x4xf32> to vector<1x4x4xf32>
      tpu.vector_store %arg7[%16, %c0_25, %c0_26], %19 {strides = array<i32>} : memref<8x4x4xf32, #tpu.memory_space<vmem>>, vector<1x4x4xf32>,
    }
    %c8_i32_21 = arith.constant 8 : i32
    return
  }
  func.func @transform_0(%arg0: i32) -> (i32, i32, i32) {
    %c0_i32 = arith.constant 0 : i32
    %c0_i32_0 = arith.constant 0 : i32
    %c0_i32_1 = arith.constant 0 : i32
    return %arg0, %c0_i32, %c0_i32_0 : i32, i32, i32
  }
  func.func @transform_1(%arg0: i32) -> (i32, i32) {
    %c0_i32 = arith.constant 0 : i32
    %c0_i32_0 = arith.constant 0 : i32
    %c0_i32_1 = arith.constant 0 : i32
    return %c0_i32, %c0_i32_0 : i32, i32
  }
  func.func @transform_2(%arg0: i32) -> (i32, i32) {
    %c0_i32 = arith.constant 0 : i32
    %c0_i32_0 = arith.constant 0 : i32
    %c0_i32_1 = arith.constant 0 : i32
    return %c0_i32, %c0_i32_0 : i32, i32
  }
  func.func @transform_3(%arg0: i32) -> (i32, i32) {
    %c0_i32 = arith.constant 0 : i32
    %c0_i32_0 = arith.constant 0 : i32
    %c0_i32_1 = arith.constant 0 : i32
    return %c0_i32, %c0_i32_0 : i32, i32
  }
  func.func @transform_4(%arg0: i32) -> (i32, i32) {
    %c0_i32 = arith.constant 0 : i32
    %c0_i32_0 = arith.constant 0 : i32
    %c0_i32_1 = arith.constant 0 : i32
    return %c0_i32, %c0_i32_0 : i32, i32
  }
  func.func @transform_5(%arg0: i32) -> (i32, i32, i32) {
    %c0_i32 = arith.constant 0 : i32
    %c0_i32_0 = arith.constant 0 : i32
    %c0_i32_1 = arith.constant 0 : i32
    return %arg0, %c0_i32, %c0_i32_0 : i32, i32, i32
  }
  func.func @transform_6(%arg0: i32) -> (i32, i32, i32) {
    %c0_i32 = arith.constant 0 : i32
    %c0_i32_0 = arith.constant 0 : i32
    %c0_i32_1 = arith.constant 0 : i32
    return %arg0, %c0_i32, %c0_i32_0 : i32, i32, i32
  }
}

</mosaic_0001>

<bundles_post_ra>
// kernel: tpu_custom_call.1
= control target key start
LH: loop header
LB: loop body
LE: loop exit
PB: predicated region body
PF: predicated region fallthrough
CT: control target
= control target key end

     0   :  { %12 = vsyncpa [#allocation5], 0  ;;  %s791_s0 = inlined_call_operand.hbm [shape: f32[8,16,16], index: 0, kind: input, shape index: {}]   ;;  %s792_s1 = inlined_call_operand.vmem [shape: f32[8,16], index: 1, kind: input, shape index: {}]   ;;  %s793_s2 = inlined_call_operand.vmem [shape: f32[16,8], index: 2, kind: input, shape index: {}]   ;;  %s794_s3 = inlined_call_operand.vmem [shape: f32[4,8], index: 3, kind: input, shape index: {}]   ;;  %s795_s4 = inlined_call_operand.vmem [shape: f32[8,4], index: 4, kind: input, shape index: {}]   ;;  %s796_s5 = inlined_call_operand.hbm [shape: f32[8,8,8], index: 5, kind: output, shape index: {0}]   ;;  %s797_s6 = inlined_call_operand.vmem [shape: f32[8,4,4], index: 6, kind: output, shape index: {1}]  }
   0x1   :  { %13 = vsyncpa [#allocation6], 0  ;;  %s677_s21 = smov [#allocation4]   ;;  %s605_s25 = scalar_lea.hbm %s791_s0, 2048 }
   0x2   :  { %s19_s22 = sshll.u32 %s677_s21, 4  ;;  %p606_p0 = scmp.ne.s32.totalorder %s791_s0, %s605_s25  ;;  %s20_s22 = int_to_ptr.vmem [resolvable:$true] %s19_s22 }
   0x3   :  { %p609_p1 = scmp.lt.u32.totalorder %s605_s25, %s791_s0 }
   0x5   :  { %p611_p2 = pnand %p609_p1, %p606_p0 }
   0x7   :  { %614 = shalt.err (!%p611_p2)
}
   0x8   :  { %s615_s30 = scalar_lea.vmem %s20_s22, 2048  ;;  %p620_p4 = scmp.lt.s32.totalorder %s20_s22, %s20_s22 }
   0x9   :  { %p616_p3 = scmp.ne.s32.totalorder %s20_s22, %s615_s30  ;;  %p621_p5 = scmp.lt.s32.totalorder %s615_s30, %s615_s30 }
   0xb   :  { %p622_p6 = por %p621_p5, %p620_p4 }
   0xd   :  { %p623_p7 = pnand %p622_p6, %p616_p3 }
   0xf   :  { %626 = shalt.err (!%p623_p7)
}
  0x10   :  { %s678_s7 = smov 128   ;;  %s679_s8 = smov 8  }
  0x11   :  { %25 = dma.hbm_to_vmem [thread:$0]  %s791_s0, 2048, %s20_s22, [#allocation5], %s678_s7, %s678_s7, %s679_s8  }
  0x12   :  { %661 = dma.done.wait [#allocation5], 2048  }
  0x13   :  { %662 = vsyncadd [#allocation5], 4294965248  ;;  %v37_v0 = vld [vmem:[%s792_s1] sm:$0xff]  ;;  %v39_v2 = vld [vmem:[%s793_s2 + $0x8] sm:$0xff]  ;;  %s665_s17 = smov 0  }
  0x14   :  { %v38_v1 = vld [vmem:[%s793_s2] sm:$0xff] }
  0x15 LB: > { %v680_v3 = vmov 0.0|0.0   ;;  %vm681_vm0 = vmmov 0   ;;  %v682_v4 = vmov 0.0   ;;  %s495_s0 = sshll.u32 %s667_s17, 4  ;;  %vm50_vm1 = vcmask 130048   ;;  %s497_s1 = sshll.u32 %s667_s17, 3  ;;  %s667_s17 = sphi %s665_s17, %s45_s17  }
  0x16   : > { %561 = vmatprep.subr.bf16.mxu0 %v680_v3  ;;  %532 = vmatprep.mubr.msk.f32.mxu0 %vm681_vm0, %v682_v4  ;;  %s47_s18 = scalar_lea.vmem [#allocation4], %s495_s0  ;;  %s125_s2 = scalar_lea.vmem [#allocation2], %s497_s1 }
  0x17   : > { %v48_v5 = vld [vmem:[%s47_s18] sm:$0xff]  ;;  %v49_v6 = vld [vmem:[%s47_s18 + $0x8] sm:$0xff]  ;;  %s45_s17 = sadd.s32 1, %s667_s17  }
  0x18   : > { %v562_v7 = vpack.c.bf16 %v49_v6, %v48_v5  ;;  %p42_p8 = scmp.ge.s32.totalorder %s45_s17, 8  }
  0x19   :  { %v564_v10 = vpack.c.bf16 (%p42_p8), %v39_v2, %v38_v1  ;;  %v274_v19 = vld [vmem:[%s794_s3] sm:$0xf] (%p42_p8)  ;;  %vm265_vm2 = vcmask (%p42_p8), 64512   ;;  %s669_s3 = smov (%p42_p8), 0  }
  0x1a   : > { %563 = vmatpush3.bf16.msra.mxu0 %v562_v7  ;;  %v275_v20 = vld [vmem:[%s795_s4] sm:$0xff] (%p42_p8) }
  0x1b   :  { %565 = vmatprep.subr.bf16.mxu0 (%p42_p8), %v564_v10  ;;  %568 = vmatprep.subr.bf16.mxu1 (%p42_p8), %v564_v10 }
  0x1c   :  { %569 = vmatpush3.bf16.msra.mxu1 (%p42_p8), %v564_v10 }
  0x1d   : > { %533 = vmatmul.mubr.msk.f32.vlgmr.msra.gmra.mrb[0].mxu0 %vm50_vm1, %v37_v0 }
  0x1e   :  { %567 = vmatpush3.bf16.msra.mxu0 (%p42_p8), %v564_v10 }
  0xeb   :  { %44 = sbr.rel (!%p42_p8) target bundleno = 21 (0x15), region = 79 }
  0xf0   : > { %v120_v8 = vpop.f32.mrb[0].mxu0 }
  0xf1   : > { %126 = vst.msk [vmem:[%s125_s2] sm:$0xff] %vm50_vm1, %v120_v8  ;;  %v534_v9 = vpop.f32.mrb[1].mxu0 }
  0xf8   :  { %v127_v11 = vld [vmem:[#allocation2] sm:$0xff]  ;;  %v128_v13 = vld [vmem:[#allocation2 + $0x8] sm:$0xff]  ;;  %v129_v15 = vld [vmem:[#allocation2 + $0x10] sm:$0xff] }
  0xf9   :  { %v131_v12 = vld [vmem:[#allocation2 + $0x20] sm:$0xff]  ;;  %539 = vmatprep.mubr.msk.f32.mxu0 %vm50_vm1, %v127_v11  ;;  %v132_v14 = vld [vmem:[#allocation2 + $0x28] sm:$0xff]  ;;  %v133_v16 = vld [vmem:[#allocation2 + $0x30] sm:$0xff] }
  0xfa   :  { %545 = vmatprep.mubr.msk.f32.mxu1 %vm50_vm1, %v131_v12  ;;  %540 = vmatmul.mubr.msk.f32.vlgmr.msra.gmra.mrb[0].mxu0 %vm50_vm1, %v128_v13  ;;  %v130_v17 = vld [vmem:[#allocation2 + $0x18] sm:$0xff] }
  0xfb   :  { %546 = vmatmul.mubr.msk.f32.vlgmr.msra.gmra.mrb[0].mxu1 %vm50_vm1, %v132_v14  ;;  %542 = vmatprep.mubr.msk.f32.mxu0 %vm50_vm1, %v129_v15  ;;  %v134_v18 = vld [vmem:[#allocation2 + $0x38] sm:$0xff] }
  0xfc   :  { %548 = vmatprep.mubr.msk.f32.mxu1 %vm50_vm1, %v133_v16 }
  0xfe   :  { %543 = vmatmul.mubr.msk.f32.gmra.mrb[2].mxu0 %vm50_vm1, %v130_v17 }
  0xff   :  { %549 = vmatmul.mubr.msk.f32.gmra.mrb[2].mxu1 %vm50_vm1, %v134_v18 }
 0x1cd   :  { %v541_v21 = vpop.f32.mrb[0].mxu0 }
 0x1ce   :  { %v547_v22 = vpop.f32.mrb[0].mxu1  ;;  %267 = vst.msk [vmem:[#allocation7 + $0x8] sm:$0xff] %vm265_vm2, %v541_v21  ;;  %v226_v23 = vpop.f32.mrb[1].mxu0 }
 0x1cf   :  { %271 = vst.msk [vmem:[#allocation7 + $0x28] sm:$0xff] %vm265_vm2, %v547_v22  ;;  %v246_v24 = vpop.f32.mrb[1].mxu1  ;;  %266 = vst.msk [vmem:[#allocation7] sm:$0xff] %vm265_vm2, %v226_v23 }
 0x1d0   :  { %270 = vst.msk [vmem:[#allocation7 + $0x20] sm:$0xff] %vm265_vm2, %v246_v24 }
 0x1d1   :  { %v544_v25 = vpop.f32.mrb[2].mxu0 }
 0x1d2   :  { %v550_v26 = vpop.f32.mrb[2].mxu1  ;;  %269 = vst.msk [vmem:[#allocation7 + $0x18] sm:$0xff] %vm265_vm2, %v544_v25  ;;  %v236_v27 = vpop.f32.mrb[3].mxu0 }
 0x1d3   :  { %273 = vst.msk [vmem:[#allocation7 + $0x38] sm:$0xff] %vm265_vm2, %v550_v26  ;;  %v256_v28 = vpop.f32.mrb[3].mxu1  ;;  %268 = vst.msk [vmem:[#allocation7 + $0x10] sm:$0xff] %vm265_vm2, %v236_v27 }
 0x1d4   :  { %272 = vst.msk [vmem:[#allocation7 + $0x30] sm:$0xff] %vm265_vm2, %v256_v28 }
 0x1d5 LB: > { %v683_v29 = vmov 0.0   ;;  %vm684_vm3 = vmmov 0   ;;  %s506_s4 = sshll.u32 %s671_s3, 3  ;;  %s508_s24 = sshll.u32 %s671_s3, 2  ;;  %vm360_vm4 = vcmask 60416   ;;  %s671_s3 = sphi %s669_s3, %s281_s3  }
 0x1d6   : > { %551 = vmatprep.subr.mxu0 %v683_v29  ;;  %553 = vmatprep.mubr.msk.f32.mxu0 %vm684_vm3, %v683_v29  ;;  %s283_s23 = scalar_lea.vmem [#allocation7], %s506_s4  ;;  %s359_s25 = scalar_lea.vmem [#allocation3], %s508_s24 }
 0x1d7   : > { %s281_s3 = sadd.s32 1, %s671_s3  }
 0x1d8   : > { %p278_p9 = scmp.ge.s32.totalorder %s281_s3, 8  }
 0x1d9   :  { %s673_s26 = smov (%p278_p9), 0  }
 0x1db   : > { %v284_v30 = vld [vmem:[%s283_s23] sm:$0xff] }
 0x1dc   : > { %552 = vmatpush3.msra.mxu0 %v284_v30 }
 0x1dd   : > { %554 = vmatmul.mubr.msk.f32.vlgmr.msra.gmra.mrb[0].mxu0 %vm265_vm2, %v274_v19 }
 0x2ab   :  { %280 = sbr.rel (!%p278_p9) target bundleno = 469 (0x1d5), region = 90 }
 0x2b0   : > { %v354_v31 = vpop.f32.mrb[0].mxu0 }
 0x2b1   : > { %361 = vst.msk [vmem:[%s359_s25] sm:$0xf] %vm360_vm4, %v354_v31  ;;  %v555_v32 = vpop.f32.mrb[1].mxu0 }
 0x2b2 LB: > { %v685_v33 = vmov 0.0   ;;  %vm686_vm5 = vmmov 0   ;;  %s509_s27 = sshll.u32 %s675_s26, 2  ;;  %vm445_vm6 = vcmask 27648   ;;  %s367_s26 = sadd.s32 1, %s675_s26   ;;  %s675_s26 = sphi %s673_s26, %s367_s26  }
 0x2b3   : > { %556 = vmatprep.subr.mxu0 %v685_v33  ;;  %558 = vmatprep.mubr.msk.f32.mxu0 %vm686_vm5, %v685_v33  ;;  %s369_s28 = scalar_lea.vmem [#allocation3], %s509_s27  ;;  %s444_s9 = scalar_lea.vmem %s797_s6, %s509_s27 }
 0x2b4   : > { %557 = vmatpush3.msra.mxu0 %v275_v20  ;;  %p364_p10 = scmp.ge.s32.totalorder %s367_s26, 8  }
 0x2b5   :  { %s687_s10 = smov (%p364_p10), [#allocation7]  }
 0x2b6   :  { %s452_s11 = sshll.u32 (%p364_p10), %s687_s10, 4  ;;  %s453_s11 = int_to_ptr.vmem [resolvable:$true] %s452_s11 }
 0x2b7   :  { %s627_s12 = scalar_lea.vmem (%p364_p10), %s453_s11, 1024  ;;  %p632_p12 = scmp.lt.s32.totalorder (%p364_p10), %s453_s11, %s453_s11 }
 0x2b8   : > { %v370_v34 = vld [vmem:[%s369_s28] sm:$0xf]  ;;  %p628_p11 = scmp.ne.s32.totalorder (%p364_p10), %s453_s11, %s627_s12  ;;  %p633_p13 = scmp.lt.s32.totalorder (%p364_p10), %s627_s12, %s627_s12 }
 0x2b9   : > { %559 = vmatmul.mubr.msk.f32.vlgmr.msra.gmra.mrb[0].mxu0 %vm265_vm2, %v370_v34 }
 0x2ba   :  { %p634_p0 = por (%p364_p10), %p633_p13, %p632_p12 }
 0x2bc   :  { %p635_p1 = pnand (%p364_p10), %p634_p0, %p628_p11 }
 0x387   :  { %366 = sbr.rel (!%p364_p10) target bundleno = 690 (0x2b2), region = 101 }
 0x38c   : > { %v440_v35 = vpop.f32.mrb[0].mxu0 }
 0x38d   : > { %446 = vst.msk [vmem:[%s444_s9] sm:$0xf] %vm445_vm6, %v440_v35  ;;  %v560_v36 = vpop.f32.mrb[1].mxu0 }
 0x38e   :  { %638 = shalt.err (!%p635_p1)
}
 0x38f   :  { %s639_s15 = scalar_lea.hbm %s796_s5, 1024 }
 0x390   :  { %p640_p2 = scmp.ne.s32.totalorder %s796_s5, %s639_s15  ;;  %p643_p3 = scmp.lt.u32.totalorder %s639_s15, %s796_s5 }
 0x392   :  { %p645_p4 = pnand %p643_p3, %p640_p2 }
 0x394   :  { %648 = shalt.err (!%p645_p4)
}
 0x395   :  { %458 = dma.vmem_to_hbm [thread:$0]  %s453_s11, 1024, %s796_s5, [#allocation6], %s678_s7, %s678_s7, %s679_s8  }
 0x396   :  { %663 = dma.done.wait [#allocation6], 1024  }
 0x397   :  { %664 = vsyncadd [#allocation6], 4294966272 }
 0x398   :  { %466 = vsyncpa [#allocation5], 1 }
 0x399   :  { %467 = vsyncpa [#allocation6], 1 }

</bundles_post_ra>
